<compile_context>
chip_gen: v7x
topology: tpu7x:2x2x1
jax: 0.10.0
libtpu: 0.0.40
codegen_flags: <defaults>
</compile_context>

<pallas_src>
import jax
import jax.numpy as jnp
from jax.experimental import pallas as pl
from jax.experimental.pallas import tpu as pltpu


# ---------------------------------------------------------------------------
# Demo Pallas kernel (NOT used by the forward — the reference forward does no
# tensor work).
# ---------------------------------------------------------------------------

def _copy_kernel(x_ref, o_ref):
    # Identity copy of the current lane-dense tile.
    o_ref[...] = x_ref[...]


_LANE = 128                      # TPU lane width (last dim of every block).
_SUBLANE = 8                     # sublane alignment for the row axis.
_MAX_BLOCK_BYTES = 4 << 20       # 4 MiB/block; x4 (in+out, double-buffered) = 16 MiB VMEM.
_SPLIT_BYTES = 4 << 20           # above this total size, force >=2 grid steps (v7x megacore).
_VMEM_LIMIT_BYTES = 32 << 20     # explicit cap: safe on v5e/v6e (128 MiB) and v7x (64 MiB).


def _round_up(x: int, m: int) -> int:
    return ((x + m - 1) // m) * m


def _passthrough(x: jax.Array) -> jax.Array:
    """Lane-dense Pallas identity copy of `x` (demo/test path only)."""
    orig_shape = x.shape
    n = x.size
    itemsize = jnp.dtype(x.dtype).itemsize

    # Pad the flattened data to a multiple of 8*128 elements so the 2-D view is
    # exactly (rows, 128) with rows % 8 == 0: full-width unmasked stores, no
    # masked-store fallback for non-lane-aligned element counts.
    flat = x.reshape(-1)
    n_pad = _round_up(n, _SUBLANE * _LANE)
    if n_pad != n:
        flat = jnp.pad(flat, (0, n_pad - n))
    rows = n_pad // _LANE
    x2 = flat.reshape(rows, _LANE)

    # Largest sublane-aligned row count whose block stays <= _MAX_BLOCK_BYTES.
    row_bytes = _LANE * itemsize
    cap_rows = max(_SUBLANE, (_MAX_BLOCK_BYTES // row_bytes) // _SUBLANE * _SUBLANE)

    total_bytes = rows * row_bytes
    if total_bytes >= _SPLIT_BYTES:
        # Bandwidth-bound size: guarantee at least 2 grid steps so the "parallel"
        # axis shards the copy across both v7x TensorCores (each with its own DMA
        # path), while each block stays <= 4 MiB.
        half_rows = _round_up(pl.cdiv(rows, 2), _SUBLANE)
        tile_rows = min(half_rows, cap_rows)
    else:
        # Small / mid-sized: one (or few) big blocks; per-step overhead dominates
        # any megacore benefit here.
        tile_rows = min(rows, cap_rows)

    grid = (pl.cdiv(rows, tile_rows),)

    y2 = pl.pallas_call(
        _copy_kernel,
        out_shape=jax.ShapeDtypeStruct(x2.shape, x2.dtype),
        grid=grid,
        in_specs=[pl.BlockSpec((tile_rows, _LANE), lambda r: (r, 0))],
        out_specs=pl.BlockSpec((tile_rows, _LANE), lambda r: (r, 0)),
        compiler_params=pltpu.CompilerParams(
            dimension_semantics=("parallel",),
            vmem_limit_bytes=_VMEM_LIMIT_BYTES,
        ),
    )(x2)

    # Strip the pad and restore the original shape.
    return y2.reshape(-1)[:n].reshape(orig_shape)


# ---------------------------------------------------------------------------
# Forward pass — faithful to the reference: no tensor work, no kernel launch,
# no host sync.  Just {'loss': None}.
# ---------------------------------------------------------------------------

def your_new_model_forward(inputs: dict) -> dict:
    """JAX/Pallas equivalent of _YourNewModel.forward.

    The reference module defines no layers and performs no computation, so the
    hot path is literally "return {'loss': None}".  Launching any kernel here
    would be pure wasted HBM bandwidth + dispatch latency.
    """
    # TODO(synk): the template stub has no tensor computation to translate; the
    # Pallas copy kernel above is exercised only as a demo under __main__.
    loss = None
    results = {"loss": loss}
    return results


if __name__ == "__main__":
    key = jax.random.PRNGKey(0)
    # Small synthetic time-series batch: batch=2, seq=8, hidden=32.
    X = jax.random.normal(key, (2, 8, 32), dtype=jnp.float32)
    inputs = {"X": X}

    # Forward semantics match the reference stub exactly.
    results = your_new_model_forward(inputs)
    assert results == {"loss": None}

    # Exercise the (demo-only) Pallas lane-dense pass-through kernel and verify it.
    y = _passthrough(X)
    jax.block_until_ready(y)
    assert jnp.array_equal(y, X)

    print("KERNEL_OK")
</pallas_src>

<mosaic_0001>
module attributes {stable_mosaic.version = 11 : i64} {
  func.func @_copy_kernel(%arg0: i32, %arg1: memref<8x128xf32, #tpu.memory_space<vmem>>, %arg2: memref<8x128xf32, #tpu.memory_space<vmem>>) attributes {dimension_semantics = [#tpu.dimension_semantics<parallel>], iteration_bounds = array<i64: 1>, scalar_prefetch = 0 : i64, scratch_operands = 0 : i64, tpu.core_type = #tpu.core_type<tc>, window_params = [{transform_indices = @transform_0, window_bounds = array<i64: 8, 128>}, {transform_indices = @transform_1, window_bounds = array<i64: 8, 128>}]} {
    %c0 = arith.constant 0 : index
    %c0_0 = arith.constant 0 : index
    %0 = vector.load %arg1[%c0, %c0_0] : memref<8x128xf32, #tpu.memory_space<vmem>>, vector<8x128xf32>
    %c0_1 = arith.constant 0 : index
    %c0_2 = arith.constant 0 : index
    %1 = vector.load %arg2[%c0_1, %c0_2] : memref<8x128xf32, #tpu.memory_space<vmem>>, vector<8x128xf32>
    tpu.vector_store %arg2[%c0_1, %c0_2], %0 {strides = array<i32>} : memref<8x128xf32, #tpu.memory_space<vmem>>, vector<8x128xf32>,
    return
  }
  func.func @transform_0(%arg0: i32) -> (i32, i32) {
    %c0_i32 = arith.constant 0 : i32
    %c0_i32_0 = arith.constant 0 : i32
    return %arg0, %c0_i32 : i32, i32
  }
  func.func @transform_1(%arg0: i32) -> (i32, i32) {
    %c0_i32 = arith.constant 0 : i32
    %c0_i32_0 = arith.constant 0 : i32
    return %arg0, %c0_i32 : i32, i32
  }
}

</mosaic_0001>

<bundles_post_ra>
// kernel: tpu_custom_call.1
= control target key start
LH: loop header
LB: loop body
LE: loop exit
PB: predicated region body
PF: predicated region fallthrough
CT: control target
= control target key end

     0   :  { %6 = vsyncpa [#allocation3], 0  ;;  %s124_s0 = inlined_call_operand.hbm [shape: f32[8,128], index: 0, kind: input, shape index: {}]   ;;  %s125_s1 = inlined_call_operand.hbm [shape: f32[8,128], index: 1, kind: output, shape index: {}]  }
   0x1   :  { %7 = vsyncpa [#allocation4], 0  ;;  %s88_s6 = smov [#allocation2]   ;;  %s40_s10 = scalar_lea.hbm %s124_s0, 128 }
   0x2   :  { %s14_s7 = sshll.u32 %s88_s6, 4  ;;  %p41_p0 = scmp.ne.s32.totalorder %s124_s0, %s40_s10  ;;  %s15_s7 = int_to_ptr.vmem [resolvable:$true] %s14_s7 }
   0x3   :  { %p44_p1 = scmp.lt.u32.totalorder %s40_s10, %s124_s0 }
   0x5   :  { %p46_p2 = pnand %p44_p1, %p41_p0 }
   0x7   :  { %49 = shalt.err (!%p46_p2)
}
   0x8   :  { %s50_s15 = scalar_lea.vmem %s15_s7, 128  ;;  %p55_p4 = scmp.lt.s32.totalorder %s15_s7, %s15_s7 }
   0x9   :  { %p51_p3 = scmp.ne.s32.totalorder %s15_s7, %s50_s15  ;;  %p56_p5 = scmp.lt.s32.totalorder %s50_s15, %s50_s15 }
   0xb   :  { %p57_p6 = por %p56_p5, %p55_p4 }
   0xd   :  { %p58_p7 = pnand %p57_p6, %p51_p3 }
   0xf   :  { %61 = shalt.err (!%p58_p7)
}
  0x10   :  { %17 = dma.hbm_to_vmem [thread:$0]  %s124_s0, 128, %s15_s7, [#allocation3]  }
  0x11   :  { %84 = dma.done.wait [#allocation3], 128  }
  0x12   :  { %85 = vsyncadd [#allocation3], 4294967168  ;;  %s89_s18 = smov [#allocation5]   ;;  %v21_v0 = vld [vmem:[#allocation2] sm:$0xff] }
  0x13   :  { %s29_s19 = sshll.u32 %s89_s18, 4  ;;  %22 = vst [vmem:[#allocation5] sm:$0xff] %v21_v0  ;;  %s30_s19 = int_to_ptr.vmem [resolvable:$true] %s29_s19 }
  0x14   :  { %s62_s20 = scalar_lea.vmem %s30_s19, 128  ;;  %p67_p9 = scmp.lt.s32.totalorder %s30_s19, %s30_s19 }
  0x15   :  { %p63_p8 = scmp.ne.s32.totalorder %s30_s19, %s62_s20  ;;  %p68_p10 = scmp.lt.s32.totalorder %s62_s20, %s62_s20 }
  0x17   :  { %p69_p11 = por %p68_p10, %p67_p9 }
  0x19   :  { %p70_p12 = pnand %p69_p11, %p63_p8 }
  0x1b   :  { %73 = shalt.err (!%p70_p12)
}
  0x1c   :  { %s74_s23 = scalar_lea.hbm %s125_s1, 128 }
  0x1d   :  { %p75_p13 = scmp.ne.s32.totalorder %s125_s1, %s74_s23  ;;  %p78_p0 = scmp.lt.u32.totalorder %s74_s23, %s125_s1 }
  0x1f   :  { %p80_p1 = pnand %p78_p0, %p75_p13 }
  0x21   :  { %83 = shalt.err (!%p80_p1)
}
  0x22   :  { %32 = dma.vmem_to_hbm [thread:$0]  %s30_s19, 128, %s125_s1, [#allocation4]  }
  0x23   :  { %86 = dma.done.wait [#allocation4], 128  }
  0x24   :  { %87 = vsyncadd [#allocation4], 4294967168 }
  0x25   :  { %36 = vsyncpa [#allocation3], 1 }
  0x26   :  { %37 = vsyncpa [#allocation4], 1 }

</bundles_post_ra>
